<compile_context>
chip_gen: v5e
topology: v5e:2x2
jax: 0.10.0
libtpu: 0.0.40
codegen_flags: <defaults>
</compile_context>

<pallas_src>
import functools

import jax
import jax.numpy as jnp
import numpy as np
from jax.experimental import pallas as pl
from jax.experimental.pallas import tpu as pltpu

HIDDEN = 64     # fc1/fc2 width from the PyTorch module
HPAD = 128      # lane-dense width used for hidden activations and the output


def _round_up(n, m):
    return ((n + m - 1) // m) * m


def qnetwork_kernel(x_ref, p_ref, out_ref, *, in_pad, hpad):
    """relu(x@W1) -> relu(.@W2) -> .@W3 ; biases are folded into the weights."""
    x = x_ref[...]                                       # (tb, in_pad)
    w1 = p_ref[pl.ds(0, in_pad), :]                      # (in_pad, hpad)
    w2 = p_ref[pl.ds(in_pad, hpad), :]                   # (hpad, hpad)
    w3 = p_ref[pl.ds(in_pad + hpad, hpad), :]            # (hpad, hpad)
    h1 = jnp.maximum(jnp.dot(x, w1, preferred_element_type=jnp.float32), 0.0)
    h2 = jnp.maximum(jnp.dot(h1, w2, preferred_element_type=jnp.float32), 0.0)
    out_ref[...] = jnp.dot(
        h2, w3, preferred_element_type=jnp.float32).astype(out_ref.dtype)


def pack_qnetwork_params(params, state_size, action_size, hidden=HIDDEN):
    """Pack w1,b1,w2,b2,w3,b3 into one (in_pad + 2*HPAD, HPAD) f32 array.

    Bias folding: the padded input has a 1.0 at column `state_size`; row
    `state_size` of block 1 holds b1 plus a 1.0 at column `hidden`, which
    re-creates the ones column in h1 (ReLU(1)=1). Row `hidden` of blocks 2/3
    then holds b2 / b3 (block 2 also re-propagates the ones column).
    """
    assert hidden + 1 <= HPAD and action_size <= HPAD
    S, H, A = state_size, hidden, action_size
    in_pad = _round_up(S + 1, 8)

    blk1 = jnp.zeros((in_pad, HPAD), jnp.float32)
    blk1 = blk1.at[:S, :H].set(params["w1"])
    blk1 = blk1.at[S, :H].set(params["b1"])
    blk1 = blk1.at[S, H].set(1.0)                        # propagate ones column

    blk2 = jnp.zeros((HPAD, HPAD), jnp.float32)
    blk2 = blk2.at[:H, :H].set(params["w2"])
    blk2 = blk2.at[H, :H].set(params["b2"])
    blk2 = blk2.at[H, H].set(1.0)                        # propagate ones column

    blk3 = jnp.zeros((HPAD, HPAD), jnp.float32)
    blk3 = blk3.at[:H, :A].set(params["w3"])
    blk3 = blk3.at[H, :A].set(params["b3"])

    return jnp.concatenate([blk1, blk2, blk3], axis=0)


def qnetwork_forward(x, packed, state_size, action_size, *, tile_b=256):
    """Fused QNetwork forward.

    x:      (B, state_size) float32
    packed: result of pack_qnetwork_params
    returns (B, action_size) float32
    """
    assert tile_b % 8 == 0
    B = x.shape[0]
    S = state_size
    in_pad = _round_up(S + 1, 8)
    rows = in_pad + 2 * HPAD
    assert packed.shape == (rows, HPAD)

    # Batch tiling: pad B to a sublane multiple (8) and to the tile size.
    if B <= tile_b:
        tb = _round_up(B, 8)
        b_pad = tb
    else:
        tb = tile_b
        b_pad = _round_up(B, tb)

    # Augment input with the ones column (bias fold) and pad to (b_pad, in_pad).
    x_pad = jnp.zeros((b_pad, in_pad), jnp.float32)
    x_pad = x_pad.at[:B, :S].set(x.astype(jnp.float32))
    x_pad = x_pad.at[:B, S].set(1.0)

    grid = (b_pad // tb,)
    kernel = functools.partial(qnetwork_kernel, in_pad=in_pad, hpad=HPAD)

    out = pl.pallas_call(
        kernel,
        out_shape=jax.ShapeDtypeStruct((b_pad, HPAD), jnp.float32),
        grid=grid,
        in_specs=[
            pl.BlockSpec((tb, in_pad), lambda i: (i, 0)),      # batch tile
            pl.BlockSpec((rows, HPAD), lambda i: (0, 0)),      # weights resident
        ],
        out_specs=pl.BlockSpec((tb, HPAD), lambda i: (i, 0)),  # lane-dense out
        compiler_params=pltpu.CompilerParams(
            dimension_semantics=("parallel",)),                # megacore on v7x
    )(x_pad, packed)

    return out[:B, :action_size]


def init_qnetwork_params(key, state_size, action_size, hidden=HIDDEN):
    """torch.nn.Linear default init: U(-1/sqrt(fan_in), 1/sqrt(fan_in))."""
    def linear(k, fan_in, fan_out):
        kw, kb = jax.random.split(k)
        bound = 1.0 / np.sqrt(fan_in)
        w = jax.random.uniform(kw, (fan_in, fan_out), jnp.float32, -bound, bound)
        b = jax.random.uniform(kb, (fan_out,), jnp.float32, -bound, bound)
        return w, b

    k1, k2, k3 = jax.random.split(key, 3)
    w1, b1 = linear(k1, state_size, hidden)
    w2, b2 = linear(k2, hidden, hidden)
    w3, b3 = linear(k3, hidden, action_size)
    return {"w1": w1, "b1": b1, "w2": w2, "b2": b2, "w3": w3, "b3": b3}


def qnetwork_reference(x, p):
    """Pure-JAX reference (high-precision matmuls) for correctness check."""
    hi = jax.lax.Precision.HIGHEST
    h1 = jnp.maximum(jnp.dot(x, p["w1"], precision=hi) + p["b1"], 0.0)
    h2 = jnp.maximum(jnp.dot(h1, p["w2"], precision=hi) + p["b2"], 0.0)
    return jnp.dot(h2, p["w3"], precision=hi) + p["b3"]


if __name__ == "__main__":
    state_size, action_size = 8, 4          # LunarLander-v2

    key = jax.random.PRNGKey(0)
    k_params, k_small, k_big = jax.random.split(key, 3)
    params = init_qnetwork_params(k_params, state_size, action_size)
    packed = pack_qnetwork_params(params, state_size, action_size)

    # act()-sized call (tiny batch, single grid step).
    x_small = jax.random.normal(k_small, (2, state_size), jnp.float32)
    q_small = jax.block_until_ready(
        qnetwork_forward(x_small, packed, state_size, action_size))
    np.testing.assert_allclose(
        np.asarray(q_small), np.asarray(qnetwork_reference(x_small, params)),
        rtol=1e-4, atol=1e-4)

    # Replay-batch-sized call with a small tile to exercise the parallel
    # batch grid (grid = 2 steps, weights stay VMEM resident).
    x_big = jax.random.normal(k_big, (64, state_size), jnp.float32)
    q_big = jax.block_until_ready(
        qnetwork_forward(x_big, packed, state_size, action_size, tile_b=32))
    np.testing.assert_allclose(
        np.asarray(q_big), np.asarray(qnetwork_reference(x_big, params)),
        rtol=1e-4, atol=1e-4)

    print("KERNEL_OK")
</pallas_src>

<mosaic_0001>
module attributes {stable_mosaic.version = 11 : i64} {
  func.func @qnetwork_kernel(%arg0: i32, %arg1: memref<8x16xf32, #tpu.memory_space<vmem>>, %arg2: memref<272x128xf32, #tpu.memory_space<vmem>>, %arg3: memref<8x128xf32, #tpu.memory_space<vmem>>) attributes {dimension_semantics = [#tpu.dimension_semantics<parallel>], iteration_bounds = array<i64: 1>, scalar_prefetch = 0 : i64, scratch_operands = 0 : i64, tpu.core_type = #tpu.core_type<tc>, window_params = [{transform_indices = @transform_0, window_bounds = array<i64: 8, 16>}, {pipeline_mode = #tpu.pipeline_mode<synchronous>, transform_indices = @transform_1, window_bounds = array<i64: 272, 128>}, {transform_indices = @transform_2, window_bounds = array<i64: 8, 128>}]} {
    %c0 = arith.constant 0 : index
    %c0_0 = arith.constant 0 : index
    %0 = vector.load %arg1[%c0, %c0_0] : memref<8x16xf32, #tpu.memory_space<vmem>>, vector<8x16xf32>
    %c0_1 = arith.constant 0 : index
    %c0_2 = arith.constant 0 : index
    %1 = vector.load %arg2[%c0_1, %c0_2] : memref<272x128xf32, #tpu.memory_space<vmem>>, vector<16x128xf32>
    %c16 = arith.constant 16 : index
    %c0_3 = arith.constant 0 : index
    %2 = vector.load %arg2[%c16, %c0_3] : memref<272x128xf32, #tpu.memory_space<vmem>>, vector<128x128xf32>
    %c144 = arith.constant 144 : index
    %c0_4 = arith.constant 0 : index
    %3 = vector.load %arg2[%c144, %c0_4] : memref<272x128xf32, #tpu.memory_space<vmem>>, vector<128x128xf32>
    %cst = arith.constant dense<0.000000e+00> : vector<8x128xf32>
    %4 = tpu.matmul %0, %1, %cst {dimension_numbers = #tpu.dot_dimension_numbers<[1], [0], [0], [1], [0, 0, 1, 1], [], []>} : vector<8x16xf32>, vector<16x128xf32>, vector<8x128xf32> -> vector<8x128xf32>
    %cst_5 = arith.constant 0.000000e+00 : f32
    %5 = vector.broadcast %cst_5 : f32 to vector<8x128xf32>
    %6 = arith.maximumf %4, %5 : vector<8x128xf32>
    %cst_6 = arith.constant dense<0.000000e+00> : vector<8x128xf32>
    %7 = tpu.matmul %6, %2, %cst_6 {dimension_numbers = #tpu.dot_dimension_numbers<[1], [0], [0], [1], [0, 0, 1, 1], [], []>} : vector<8x128xf32>, vector<128x128xf32>, vector<8x128xf32> -> vector<8x128xf32>
    %cst_7 = arith.constant 0.000000e+00 : f32
    %8 = vector.broadcast %cst_7 : f32 to vector<8x128xf32>
    %9 = arith.maximumf %7, %8 : vector<8x128xf32>
    %cst_8 = arith.constant dense<0.000000e+00> : vector<8x128xf32>
    %10 = tpu.matmul %9, %3, %cst_8 {dimension_numbers = #tpu.dot_dimension_numbers<[1], [0], [0], [1], [0, 0, 1, 1], [], []>} : vector<8x128xf32>, vector<128x128xf32>, vector<8x128xf32> -> vector<8x128xf32>
    %c0_9 = arith.constant 0 : index
    %c0_10 = arith.constant 0 : index
    %11 = vector.load %arg3[%c0_9, %c0_10] : memref<8x128xf32, #tpu.memory_space<vmem>>, vector<8x128xf32>
    tpu.vector_store %arg3[%c0_9, %c0_10], %10 {strides = array<i32>} : memref<8x128xf32, #tpu.memory_space<vmem>>, vector<8x128xf32>,
    return
  }
  func.func @transform_0(%arg0: i32) -> (i32, i32) {
    %c0_i32 = arith.constant 0 : i32
    %c0_i32_0 = arith.constant 0 : i32
    return %arg0, %c0_i32 : i32, i32
  }
  func.func @transform_1(%arg0: i32) -> (i32, i32) {
    %c0_i32 = arith.constant 0 : i32
    %c0_i32_0 = arith.constant 0 : i32
    %c0_i32_1 = arith.constant 0 : i32
    return %c0_i32, %c0_i32_0 : i32, i32
  }
  func.func @transform_2(%arg0: i32) -> (i32, i32) {
    %c0_i32 = arith.constant 0 : i32
    %c0_i32_0 = arith.constant 0 : i32
    return %arg0, %c0_i32 : i32, i32
  }
}

</mosaic_0001>

<bundles_post_ra>
// kernel: tpu_custom_call.1
= control target key start
LH: loop header
LB: loop body
LE: loop exit
PB: predicated region body
PF: predicated region fallthrough
CT: control target
= control target key end

     0   :  { %7 = vsyncpa [#allocation3], 0  ;;  %s275_s0 = inlined_call_operand.hbm [shape: f32[8,16], index: 0, kind: input, shape index: {}]   ;;  %s276_s1 = inlined_call_operand.hbm [shape: f32[272,128], index: 1, kind: input, shape index: {}]   ;;  %s277_s2 = inlined_call_operand.hbm [shape: f32[8,128], index: 2, kind: output, shape index: {}]  }
   0x1   :  { %8 = vsyncpa [#allocation6], 0 }
   0x2   :  { %9 = vsyncpa [#allocation4], 0  ;;  %s15_s11 = sshll.u32 %s275_s0, 4  ;;  %s246_s12 = smov [#allocation2]   ;;  %s16_s11 = int_to_ptr.hbm [resolvable:$true] %s15_s11 }
   0x3   :  { %s17_s13 = sshll.u32 %s246_s12, 4  ;;  %s25_s16 = sshll.u32 %s276_s1, 4  ;;  %s18_s13 = int_to_ptr.vmem [resolvable:$true] %s17_s13  ;;  %s26_s16 = int_to_ptr.hbm [resolvable:$true] %s25_s16 }
   0x4   :  { %20 = dma.hbm_to_vmem [thread:$0]  %s16_s11, 128, %s18_s13, [#allocation3]  }
   0x5   :  { %s247_s17 = smov [#allocation5]   ;;  %s248_s19 = smov 128  }
   0x6   :  { %s27_s18 = sshll.u32 %s247_s17, 4  ;;  %s249_s20 = smov 8   ;;  %s28_s18 = int_to_ptr.vmem [resolvable:$true] %s27_s18 }
   0x7   :  { %33 = dma.hbm_to_vmem [thread:$0]  %s26_s16, 4352, %s28_s18, [#allocation6], %s248_s19, %s248_s19, %s249_s20  }
   0x8   :  { %240 = dma.done.wait [#allocation3], 128  }
   0x9   :  { %241 = vsyncadd [#allocation3], 4294967168 }
   0xa   :  { %242 = dma.done.wait [#allocation6], 4352  }
   0xb   :  { %243 = vsyncadd [#allocation6], 4294962944  ;;  %v44_v0 = vld [vmem:[#allocation5 + $0x8] sm:$0xff]  ;;  %v43_v1 = vld [vmem:[#allocation5] sm:$0xff]  ;;  %vm77_vm0 = vcmask 130048   ;;  %s250_s0 = smov [#allocation7]  }
   0xc   :  { %95 = vmatpush.msra.mxu0 %v44_v0  ;;  %v42_v2 = vld [vmem:[#allocation2] sm:$0xff]  ;;  %v60_v3 = vld [vmem:[#allocation5 + $0x88] sm:$0xff]  ;;  %v59_v4 = vld [vmem:[#allocation5 + $0x80] sm:$0xff]  ;;  %s149_s1 = sshll.u32 %s250_s0, 4  ;;  %s151_s23 = sshll.u32 %s277_s2, 4  ;;  %s150_s1 = int_to_ptr.vmem [resolvable:$true] %s149_s1  ;;  %s152_s23 = int_to_ptr.hbm [resolvable:$true] %s151_s23 }
   0xd   :  { %102 = vmatpush.msra.mxu1 %v60_v3  ;;  %v58_v5 = vld [vmem:[#allocation5 + $0x78] sm:$0xff]  ;;  %v57_v6 = vld [vmem:[#allocation5 + $0x70] sm:$0xff]  ;;  %v56_v7 = vld [vmem:[#allocation5 + $0x68] sm:$0xff] }
   0xe   :  { %96 = vmatpush.msra.mxu0 %v43_v1  ;;  %v55_v8 = vld [vmem:[#allocation5 + $0x60] sm:$0xff]  ;;  %v54_v9 = vld [vmem:[#allocation5 + $0x58] sm:$0xff]  ;;  %v53_v10 = vld [vmem:[#allocation5 + $0x50] sm:$0xff] }
   0xf   :  { %162 = vmatmul.msk.f32.vlgmr.msra.gmra.mxu0 %vm77_vm0, %v42_v2  ;;  %103 = vmatpush.msra.mxu1 %v59_v4  ;;  %v52_v11 = vld [vmem:[#allocation5 + $0x48] sm:$0xff]  ;;  %v51_v12 = vld [vmem:[#allocation5 + $0x40] sm:$0xff]  ;;  %v50_v13 = vld [vmem:[#allocation5 + $0x38] sm:$0xff] }
  0x10   :  { %v49_v14 = vld [vmem:[#allocation5 + $0x30] sm:$0xff]  ;;  %v48_v15 = vld [vmem:[#allocation5 + $0x28] sm:$0xff]  ;;  %v47_v16 = vld [vmem:[#allocation5 + $0x20] sm:$0xff] }
  0x11   :  { %104 = vmatpush.msra.mxu1 %v58_v5  ;;  %v46_v17 = vld [vmem:[#allocation5 + $0x18] sm:$0xff]  ;;  %v45_v18 = vld [vmem:[#allocation5 + $0x10] sm:$0xff]  ;;  %v76_v19 = vld [vmem:[#allocation5 + $0x108] sm:$0xff] }
  0x12   :  { %v75_v20 = vld [vmem:[#allocation5 + $0x100] sm:$0xff]  ;;  %123 = vmatpush.msra.mxu2 %v76_v19  ;;  %v74_v21 = vld [vmem:[#allocation5 + $0xf8] sm:$0xff]  ;;  %v73_v22 = vld [vmem:[#allocation5 + $0xf0] sm:$0xff] }
  0x13   :  { %105 = vmatpush.msra.mxu1 %v57_v6  ;;  %v72_v23 = vld [vmem:[#allocation5 + $0xe8] sm:$0xff]  ;;  %v71_v24 = vld [vmem:[#allocation5 + $0xe0] sm:$0xff]  ;;  %v70_v25 = vld [vmem:[#allocation5 + $0xd8] sm:$0xff] }
  0x14   :  { %124 = vmatpush.msra.mxu2 %v75_v20  ;;  %v69_v26 = vld [vmem:[#allocation5 + $0xd0] sm:$0xff]  ;;  %v68_v27 = vld [vmem:[#allocation5 + $0xc8] sm:$0xff]  ;;  %v67_v28 = vld [vmem:[#allocation5 + $0xc0] sm:$0xff] }
  0x15   :  { %106 = vmatpush.msra.mxu1 %v56_v7  ;;  %v66_v29 = vld [vmem:[#allocation5 + $0xb8] sm:$0xff]  ;;  %v65_v30 = vld [vmem:[#allocation5 + $0xb0] sm:$0xff]  ;;  %v64_v31 = vld [vmem:[#allocation5 + $0xa8] sm:$0xff] }
  0x16   :  { %125 = vmatpush.msra.mxu2 %v74_v21  ;;  %v63_v32 = vld [vmem:[#allocation5 + $0xa0] sm:$0xff]  ;;  %v62_v35 = vld [vmem:[#allocation5 + $0x98] sm:$0xff]  ;;  %v61_v36 = vld [vmem:[#allocation5 + $0x90] sm:$0xff] }
  0x17   :  { %107 = vmatpush.msra.mxu1 %v55_v8 }
  0x18   :  { %126 = vmatpush.msra.mxu2 %v73_v22 }
  0x19   :  { %108 = vmatpush.msra.mxu1 %v54_v9 }
  0x1a   :  { %127 = vmatpush.msra.mxu2 %v72_v23 }
  0x1b   :  { %109 = vmatpush.msra.mxu1 %v53_v10 }
  0x1c   :  { %128 = vmatpush.msra.mxu2 %v71_v24 }
  0x1d   :  { %110 = vmatpush.msra.mxu1 %v52_v11 }
  0x1e   :  { %129 = vmatpush.msra.mxu2 %v70_v25 }
  0x1f   :  { %111 = vmatpush.msra.mxu1 %v51_v12 }
  0x20   :  { %130 = vmatpush.msra.mxu2 %v69_v26 }
  0x21   :  { %112 = vmatpush.msra.mxu1 %v50_v13 }
  0x22   :  { %131 = vmatpush.msra.mxu2 %v68_v27 }
  0x23   :  { %113 = vmatpush.msra.mxu1 %v49_v14 }
  0x24   :  { %132 = vmatpush.msra.mxu2 %v67_v28 }
  0x25   :  { %114 = vmatpush.msra.mxu1 %v48_v15 }
  0x26   :  { %133 = vmatpush.msra.mxu2 %v66_v29 }
  0x27   :  { %115 = vmatpush.msra.mxu1 %v47_v16 }
  0x28   :  { %134 = vmatpush.msra.mxu2 %v65_v30 }
  0x29   :  { %116 = vmatpush.msra.mxu1 %v46_v17 }
  0x2a   :  { %135 = vmatpush.msra.mxu2 %v64_v31 }
  0x2b   :  { %117 = vmatpush.msra.mxu1 %v45_v18 }
  0x2c   :  { %136 = vmatpush.msra.mxu2 %v63_v32 }
  0x2e   :  { %137 = vmatpush.msra.mxu2 %v62_v35 }
  0x30   :  { %138 = vmatpush.msra.mxu2 %v61_v36 }
  0x8c   :  { %v98_v33 = vpop.f32.mrf.mxu0 }
  0x8d   :  { %v101_v34 = vmax.f32 %v98_v33, 0.0 }
  0x8f   :  { %118 = vmatmul.f32.vlgmr.msra.gmra.mxu1 %v101_v34 }
 0x10c   :  { %v119_v37 = vpop.f32.mrf.mxu1 }
 0x10d   :  { %v122_v38 = vmax.f32 %v119_v37, 0.0 }
 0x10f   :  { %139 = vmatmul.f32.vlgmr.msra.gmra.mxu2 %v122_v38 }
 0x192   :  { %v140_v39 = vpop.f32.mrf.mxu2 }
 0x193   :  { %143 = vst [vmem:[#allocation7] sm:$0xff] %v140_v39 }
 0x194   :  { %154 = dma.vmem_to_hbm [thread:$0]  %s150_s1, 128, %s152_s23, [#allocation4]  }
 0x195   :  { %244 = dma.done.wait [#allocation4], 128  }
 0x196   :  { %245 = vsyncadd [#allocation4], 4294967168 }
 0x197   :  { %159 = vsyncpa [#allocation3], 1 }
 0x198   :  { %160 = vsyncpa [#allocation6], 1 }
 0x199   :  { %161 = vsyncpa [#allocation4], 1 }

</bundles_post_ra>
